<compile_context>
chip_gen: v7x
topology: tpu7x:2x2x1
jax: 0.10.0
libtpu: 0.0.40
codegen_flags: <defaults>
</compile_context>

<pallas_src>
import jax
import jax.numpy as jnp
from jax.experimental import pallas as pl
from jax.experimental.pallas import tpu as pltpu

_NEG_BIG = -1e30  # "minus infinity" for padded softmax lanes (finite -> no NaN)
_LANE = 128
_SUB = 8


def _round_up(x, m):
    return ((x + m - 1) // m) * m


# --------------------------------------------------------------------------
# Kernel: multihot-gather+Linear1 fused matmul -> tanh -> Linear2 -> log_softmax
# --------------------------------------------------------------------------
def _tagger_fused_kernel(idx_ref, wfused_ref, b1_ref, w2_ref, b2_ref, out_ref):
    TB = idx_ref.shape[0]            # batch tile (multiple of 8)
    NW = idx_ref.shape[1]            # num_words
    G = wfused_ref.shape[0]          # NW * V_pad (lane-dense contraction dim)
    V_pad = G // NW
    mm_dtype = wfused_ref.dtype      # f32 (exact) or bf16 (MXU-native)

    # ---- Multi-hot over the fused (word, vocab) axis: one VPU compare per
    # word (no matmul, no cross-lane store).  Row b has NW ones, one per word,
    # at lane w*V_pad + idx[b, w]; multihot @ W_fused == x_flat @ W1 exactly.
    idx = idx_ref[...]                                               # (TB, NW)
    lane_iota = jax.lax.broadcasted_iota(jnp.int32, (TB, G), 1)
    hot = lane_iota == idx[:, 0:1]
    for w in range(1, NW):                                           # tiny static unroll
        hot |= lane_iota == (idx[:, w:w + 1] + w * V_pad)
    multihot = hot.astype(mm_dtype)                                  # 0/1 exact in bf16

    # ---- Fused gather + layer1 + bias + tanh (single lane-dense MXU pass).
    h = jnp.tanh(
        jnp.dot(multihot, wfused_ref[...], preferred_element_type=jnp.float32)
        + b1_ref[...])

    # TODO(synk): Dropout(0.5) is identity in eval mode; training-mode masking
    # (pltpu.prng_random_bits) not implemented here.

    # ---- Layer 2 (padded output lanes carry bias -1e30 -> excluded from softmax).
    logits = jnp.dot(h.astype(mm_dtype), w2_ref[...],
                     preferred_element_type=jnp.float32) + b2_ref[...]

    # ---- Numerically stable log-softmax over the lane-dense padded axis.
    m = jnp.max(logits, axis=-1, keepdims=True)
    shifted = logits - m
    lse = jnp.log(jnp.sum(jnp.exp(shifted), axis=-1, keepdims=True))
    out_ref[...] = (shifted - lse).astype(out_ref.dtype)             # dense store


# --------------------------------------------------------------------------
# One-time parameter preparation (hoisted out of the per-call forward).
# --------------------------------------------------------------------------
def prepare_tagger1_params(embed_table, w1, b1, w2, b2, num_words, *,
                           use_bf16=False):
    """Pads to 128 lanes and folds the embedding table through layer-1.

    Weights are stored (in_features, out_features), matching y = x @ W + b.
    """
    V, E = embed_table.shape
    F, H = w1.shape
    O = w2.shape[1]
    assert F == num_words * E

    V_pad = _round_up(V, _LANE)
    H_pad = _round_up(H, _LANE)
    O_pad = _round_up(O, _LANE)

    f32 = jnp.float32
    emb = embed_table.astype(f32)
    w1_blocks = w1.astype(f32).reshape(num_words, E, H)
    # W_fused[w, v, :] = emb[v] @ W1[w*E:(w+1)*E, :]  (HIGHEST precision so the
    # exact-f32 path stays within tight tolerance of the reference).
    fused = jnp.einsum("ve,weh->wvh", emb, w1_blocks,
                       precision=jax.lax.Precision.HIGHEST)
    wfused = (jnp.zeros((num_words, V_pad, H_pad), f32)
              .at[:, :V, :H].set(fused)
              .reshape(num_words * V_pad, H_pad))
    b1_pad = jnp.zeros((1, H_pad), f32).at[0, :H].set(b1.astype(f32))
    w2_pad = jnp.zeros((H_pad, O_pad), f32).at[:H, :O].set(w2.astype(f32))
    b2_pad = jnp.full((1, O_pad), _NEG_BIG, f32).at[0, :O].set(b2.astype(f32))

    if use_bf16:  # MXU-native operands (v6e/v7x win); accumulation stays f32.
        wfused = wfused.astype(jnp.bfloat16)
        w2_pad = w2_pad.astype(jnp.bfloat16)

    return {"wfused": wfused, "b1": b1_pad, "w2": w2_pad, "b2": b2_pad,
            "out_dim": O}


# --------------------------------------------------------------------------
# Forward
# --------------------------------------------------------------------------
@jax.jit
def _tagger1_forward_padded(words_idxs, wfused, b1, w2, b2):
    B, NW = words_idxs.shape
    G, H_pad = wfused.shape
    O_pad = w2.shape[1]
    out_dtype = jnp.bfloat16 if wfused.dtype == jnp.bfloat16 else jnp.float32

    # Batch tiling: big tiles amortize the ~0.35us/grid-step overhead, but cap
    # at ceil(B/2) (rounded to 8) so large batches produce >=2 grid steps and
    # the "parallel" axis actually shards across both v7x TensorCores.
    # (Cap 512 can be swept to 1024; per-tile VMEM stays ~1-2 MB either way.)
    TB = min(512, _round_up(pl.cdiv(B, 2), _SUB))
    B_pad = _round_up(B, TB)
    idx_pad = (jnp.zeros((B_pad, NW), jnp.int32)
               .at[:B].set(words_idxs.astype(jnp.int32)))
    grid = (B_pad // TB,)

    out_pad = pl.pallas_call(
        _tagger_fused_kernel,
        out_shape=jax.ShapeDtypeStruct((B_pad, O_pad), out_dtype),
        grid_spec=pltpu.PrefetchScalarGridSpec(
            num_scalar_prefetch=0,
            grid=grid,
            in_specs=[
                pl.BlockSpec((TB, NW), lambda i: (i, 0)),        # word indices
                pl.BlockSpec((G, H_pad), lambda i: (0, 0)),      # emb(x)W1 fused
                pl.BlockSpec((1, H_pad), lambda i: (0, 0)),      # b1 (padded)
                pl.BlockSpec((H_pad, O_pad), lambda i: (0, 0)),  # W2 (padded)
                pl.BlockSpec((1, O_pad), lambda i: (0, 0)),      # b2 (pad=-1e30)
            ],
            out_specs=pl.BlockSpec((TB, O_pad), lambda i: (i, 0)),
        ),
        compiler_params=pltpu.CompilerParams(
            dimension_semantics=("parallel",)),                  # megacore on v7x
    )(idx_pad, wfused, b1, w2, b2)
    return out_pad


def tagger1_forward(words_idxs, params):
    """words_idxs: (B, num_words) int.  Returns (B, out_dim) log-probs."""
    B = words_idxs.shape[0]
    out_pad = _tagger1_forward_padded(words_idxs, params["wfused"],
                                      params["b1"], params["w2"], params["b2"])
    return out_pad[:B, :params["out_dim"]]


# --------------------------------------------------------------------------
if __name__ == "__main__":
    # Small shapes consistent with the module
    vocab_size = 100
    embed_size = 16
    num_words = 5
    hidden_dim = 32
    out_dim = 10

    key = jax.random.PRNGKey(0)
    k_emb, k_w1, k_b1, k_w2, k_b2, k_idx1, k_idx2 = jax.random.split(key, 7)

    F = num_words * embed_size
    embed_table = jax.random.normal(k_emb, (vocab_size, embed_size), jnp.float32)
    w1 = jax.random.normal(k_w1, (F, hidden_dim), jnp.float32) * 0.1
    b1 = jax.random.normal(k_b1, (hidden_dim,), jnp.float32) * 0.1
    w2 = jax.random.normal(k_w2, (hidden_dim, out_dim), jnp.float32) * 0.1
    b2 = jax.random.normal(k_b2, (out_dim,), jnp.float32) * 0.1

    def reference(words_idxs):
        x = jnp.take(embed_table, words_idxs, axis=0).reshape(words_idxs.shape[0], F)
        h = jnp.tanh(x @ w1 + b1)
        return jax.nn.log_softmax(h @ w2 + b2, axis=-1)

    # ---- exact f32 path, small batch (grid=1) ----
    params_f32 = prepare_tagger1_params(embed_table, w1, b1, w2, b2, num_words)
    idx_small = jax.random.randint(k_idx1, (8, num_words), 0, vocab_size,
                                   dtype=jnp.int32)
    out_small = jax.block_until_ready(tagger1_forward(idx_small, params_f32))
    ref_small = reference(idx_small)
    assert out_small.shape == (8, out_dim)
    assert jnp.allclose(out_small, ref_small, atol=1e-4, rtol=1e-4), \
        float(jnp.max(jnp.abs(out_small - ref_small)))

    # ---- exact f32 path, larger batch -> multi-tile grid (>=2 steps) ----
    idx_big = jax.random.randint(k_idx2, (64, num_words), 0, vocab_size,
                                 dtype=jnp.int32)
    out_big = jax.block_until_ready(tagger1_forward(idx_big, params_f32))
    ref_big = reference(idx_big)
    assert out_big.shape == (64, out_dim)
    assert jnp.allclose(out_big, ref_big, atol=1e-4, rtol=1e-4), \
        float(jnp.max(jnp.abs(out_big - ref_big)))

    # ---- bf16 MXU-operand path (v6e/v7x throughput), looser tolerance ----
    params_bf16 = prepare_tagger1_params(embed_table, w1, b1, w2, b2, num_words,
                                         use_bf16=True)
    out_bf16 = jax.block_until_ready(tagger1_forward(idx_small, params_bf16))
    assert out_bf16.dtype == jnp.bfloat16
    assert jnp.allclose(out_bf16.astype(jnp.float32), ref_small,
                        atol=1e-1, rtol=5e-2), \
        float(jnp.max(jnp.abs(out_bf16.astype(jnp.float32) - ref_small)))

    print("KERNEL_OK")
</pallas_src>

<mosaic_0001>
module attributes {stable_mosaic.version = 11 : i64} {
  func.func @_tagger_fused_kernel(%arg0: i32, %arg1: memref<8x5xi32, #tpu.memory_space<vmem>>, %arg2: memref<640x128xf32, #tpu.memory_space<vmem>>, %arg3: memref<1x128xf32, #tpu.memory_space<vmem>>, %arg4: memref<128x128xf32, #tpu.memory_space<vmem>>, %arg5: memref<1x128xf32, #tpu.memory_space<vmem>>, %arg6: memref<8x128xf32, #tpu.memory_space<vmem>>) attributes {dimension_semantics = [#tpu.dimension_semantics<parallel>], iteration_bounds = array<i64: 1>, scalar_prefetch = 0 : i64, scratch_operands = 0 : i64, tpu.core_type = #tpu.core_type<tc>, window_params = [{transform_indices = @transform_0, window_bounds = array<i64: 8, 5>}, {pipeline_mode = #tpu.pipeline_mode<synchronous>, transform_indices = @transform_1, window_bounds = array<i64: 640, 128>}, {pipeline_mode = #tpu.pipeline_mode<synchronous>, transform_indices = @transform_2, window_bounds = array<i64: 1, 128>}, {pipeline_mode = #tpu.pipeline_mode<synchronous>, transform_indices = @transform_3, window_bounds = array<i64: 128, 128>}, {pipeline_mode = #tpu.pipeline_mode<synchronous>, transform_indices = @transform_4, window_bounds = array<i64: 1, 128>}, {transform_indices = @transform_5, window_bounds = array<i64: 8, 128>}]} {
    %c0 = arith.constant 0 : index
    %c0_0 = arith.constant 0 : index
    %0 = vector.load %arg1[%c0, %c0_0] : memref<8x5xi32, #tpu.memory_space<vmem>>, vector<8x5xi32>
    %1 = tpu.iota {dimensions = array<i32: 1>} : vector<8x640xi32>
    %2 = vector.extract_strided_slice %0 {offsets = [0, 0], sizes = [8, 1], strides = [1, 1]} : vector<8x5xi32> to vector<8x1xi32>
    %3 = vector.broadcast %2 : vector<8x1xi32> to vector<8x640xi32>
    %4 = arith.cmpi eq, %1, %3 : vector<8x640xi32>
    %5 = vector.extract_strided_slice %0 {offsets = [0, 1], sizes = [8, 1], strides = [1, 1]} : vector<8x5xi32> to vector<8x1xi32>
    %c128_i32 = arith.constant 128 : i32
    %6 = vector.broadcast %c128_i32 : i32 to vector<8x1xi32>
    %7 = arith.addi %5, %6 : vector<8x1xi32>
    %8 = vector.broadcast %7 : vector<8x1xi32> to vector<8x640xi32>
    %9 = arith.cmpi eq, %1, %8 : vector<8x640xi32>
    %10 = arith.ori %4, %9 : vector<8x640xi1>
    %11 = vector.extract_strided_slice %0 {offsets = [0, 2], sizes = [8, 1], strides = [1, 1]} : vector<8x5xi32> to vector<8x1xi32>
    %c256_i32 = arith.constant 256 : i32
    %12 = vector.broadcast %c256_i32 : i32 to vector<8x1xi32>
    %13 = arith.addi %11, %12 : vector<8x1xi32>
    %14 = vector.broadcast %13 : vector<8x1xi32> to vector<8x640xi32>
    %15 = arith.cmpi eq, %1, %14 : vector<8x640xi32>
    %16 = arith.ori %10, %15 : vector<8x640xi1>
    %17 = vector.extract_strided_slice %0 {offsets = [0, 3], sizes = [8, 1], strides = [1, 1]} : vector<8x5xi32> to vector<8x1xi32>
    %c384_i32 = arith.constant 384 : i32
    %18 = vector.broadcast %c384_i32 : i32 to vector<8x1xi32>
    %19 = arith.addi %17, %18 : vector<8x1xi32>
    %20 = vector.broadcast %19 : vector<8x1xi32> to vector<8x640xi32>
    %21 = arith.cmpi eq, %1, %20 : vector<8x640xi32>
    %22 = arith.ori %16, %21 : vector<8x640xi1>
    %23 = vector.extract_strided_slice %0 {offsets = [0, 4], sizes = [8, 1], strides = [1, 1]} : vector<8x5xi32> to vector<8x1xi32>
    %c512_i32 = arith.constant 512 : i32
    %24 = vector.broadcast %c512_i32 : i32 to vector<8x1xi32>
    %25 = arith.addi %23, %24 : vector<8x1xi32>
    %26 = vector.broadcast %25 : vector<8x1xi32> to vector<8x640xi32>
    %27 = arith.cmpi eq, %1, %26 : vector<8x640xi32>
    %28 = arith.ori %22, %27 : vector<8x640xi1>
    %29 = arith.extui %28 : vector<8x640xi1> to vector<8x640xi32>
    %30 = arith.sitofp %29 : vector<8x640xi32> to vector<8x640xf32>
    %c0_1 = arith.constant 0 : index
    %c0_2 = arith.constant 0 : index
    %31 = vector.load %arg2[%c0_1, %c0_2] : memref<640x128xf32, #tpu.memory_space<vmem>>, vector<640x128xf32>
    %cst = arith.constant dense<0.000000e+00> : vector<8x128xf32>
    %32 = tpu.matmul %30, %31, %cst {dimension_numbers = #tpu.dot_dimension_numbers<[1], [0], [0], [1], [0, 0, 1, 1], [], []>} : vector<8x640xf32>, vector<640x128xf32>, vector<8x128xf32> -> vector<8x128xf32>
    %c0_3 = arith.constant 0 : index
    %c0_4 = arith.constant 0 : index
    %33 = vector.load %arg3[%c0_3, %c0_4] : memref<1x128xf32, #tpu.memory_space<vmem>>, vector<1x128xf32>
    %34 = vector.broadcast %33 : vector<1x128xf32> to vector<8x128xf32>
    %35 = arith.addf %32, %34 : vector<8x128xf32>
    %36 = math.tanh %35 : vector<8x128xf32>
    %c0_5 = arith.constant 0 : index
    %c0_6 = arith.constant 0 : index
    %37 = vector.load %arg4[%c0_5, %c0_6] : memref<128x128xf32, #tpu.memory_space<vmem>>, vector<128x128xf32>
    %cst_7 = arith.constant dense<0.000000e+00> : vector<8x128xf32>
    %38 = tpu.matmul %36, %37, %cst_7 {dimension_numbers = #tpu.dot_dimension_numbers<[1], [0], [0], [1], [0, 0, 1, 1], [], []>} : vector<8x128xf32>, vector<128x128xf32>, vector<8x128xf32> -> vector<8x128xf32>
    %c0_8 = arith.constant 0 : index
    %c0_9 = arith.constant 0 : index
    %39 = vector.load %arg5[%c0_8, %c0_9] : memref<1x128xf32, #tpu.memory_space<vmem>>, vector<1x128xf32>
    %40 = vector.broadcast %39 : vector<1x128xf32> to vector<8x128xf32>
    %41 = arith.addf %38, %40 : vector<8x128xf32>
    %cst_10 = arith.constant dense<0xFF800000> : vector<8xf32>
    %42 = vector.multi_reduction <maximumf>, %41, %cst_10 [1] : vector<8x128xf32> to vector<8xf32>
    %43 = vector.shape_cast %42 : vector<8xf32> to vector<8x1xf32>
    %44 = vector.broadcast %43 : vector<8x1xf32> to vector<8x128xf32>
    %45 = arith.subf %41, %44 : vector<8x128xf32>
    %46 = math.exp %45 : vector<8x128xf32>
    %cst_11 = arith.constant dense<0.000000e+00> : vector<8xf32>
    %47 = vector.multi_reduction <add>, %46, %cst_11 [1] : vector<8x128xf32> to vector<8xf32>
    %48 = vector.shape_cast %47 : vector<8xf32> to vector<8x1xf32>
    %49 = math.log %48 : vector<8x1xf32>
    %50 = vector.broadcast %49 : vector<8x1xf32> to vector<8x128xf32>
    %51 = arith.subf %45, %50 : vector<8x128xf32>
    %c0_12 = arith.constant 0 : index
    %c0_13 = arith.constant 0 : index
    %52 = vector.load %arg6[%c0_12, %c0_13] : memref<8x128xf32, #tpu.memory_space<vmem>>, vector<8x128xf32>
    tpu.vector_store %arg6[%c0_12, %c0_13], %51 {strides = array<i32>} : memref<8x128xf32, #tpu.memory_space<vmem>>, vector<8x128xf32>,
    return
  }
  func.func @transform_0(%arg0: i32) -> (i32, i32) {
    %c0_i32 = arith.constant 0 : i32
    %c0_i32_0 = arith.constant 0 : i32
    return %arg0, %c0_i32 : i32, i32
  }
  func.func @transform_1(%arg0: i32) -> (i32, i32) {
    %c0_i32 = arith.constant 0 : i32
    %c0_i32_0 = arith.constant 0 : i32
    %c0_i32_1 = arith.constant 0 : i32
    return %c0_i32, %c0_i32_0 : i32, i32
  }
  func.func @transform_2(%arg0: i32) -> (i32, i32) {
    %c0_i32 = arith.constant 0 : i32
    %c0_i32_0 = arith.constant 0 : i32
    %c0_i32_1 = arith.constant 0 : i32
    return %c0_i32, %c0_i32_0 : i32, i32
  }
  func.func @transform_3(%arg0: i32) -> (i32, i32) {
    %c0_i32 = arith.constant 0 : i32
    %c0_i32_0 = arith.constant 0 : i32
    %c0_i32_1 = arith.constant 0 : i32
    return %c0_i32, %c0_i32_0 : i32, i32
  }
  func.func @transform_4(%arg0: i32) -> (i32, i32) {
    %c0_i32 = arith.constant 0 : i32
    %c0_i32_0 = arith.constant 0 : i32
    %c0_i32_1 = arith.constant 0 : i32
    return %c0_i32, %c0_i32_0 : i32, i32
  }
  func.func @transform_5(%arg0: i32) -> (i32, i32) {
    %c0_i32 = arith.constant 0 : i32
    %c0_i32_0 = arith.constant 0 : i32
    return %arg0, %c0_i32 : i32, i32
  }
}

</mosaic_0001>

<bundles_post_ra>
// kernel: _tagger1_forward_padded.1
= control target key start
LH: loop header
LB: loop body
LE: loop exit
PB: predicated region body
PF: predicated region fallthrough
CT: control target
= control target key end

     0   :  { %10 = vsyncpa [#allocation3], 0  ;;  %s1148_s0 = inlined_call_operand.hbm [shape: s32[8,5], index: 0, kind: input, shape index: {}]   ;;  %s1149_s1 = inlined_call_operand.hbm [shape: f32[640,128], index: 1, kind: input, shape index: {}]   ;;  %s1150_s2 = inlined_call_operand.vmem [shape: f32[1,128], index: 2, kind: input, shape index: {}]   ;;  %s1151_s3 = inlined_call_operand.hbm [shape: f32[128,128], index: 3, kind: input, shape index: {}]   ;;  %s1152_s4 = inlined_call_operand.vmem [shape: f32[1,128], index: 4, kind: input, shape index: {}]   ;;  %s1153_s5 = inlined_call_operand.hbm [shape: f32[8,128], index: 5, kind: output, shape index: {}]  }
   0x1   :  { %11 = vsyncpa [#allocation6], 0 }
   0x2   :  { %12 = vsyncpa [#allocation4], 0  ;;  %s972_s18 = smov [#allocation5]   ;;  %s878_s22 = scalar_lea.hbm %s1149_s1, 10240 }
   0x3   :  { %s28_s19 = sshll.u32 %s972_s18, 4  ;;  %p879_p0 = scmp.ne.s32.totalorder %s1149_s1, %s878_s22  ;;  %s29_s19 = int_to_ptr.vmem [resolvable:$true] %s28_s19 }
   0x4   :  { %p882_p1 = scmp.lt.u32.totalorder %s878_s22, %s1149_s1 }
   0x6   :  { %p884_p2 = pnand %p882_p1, %p879_p0 }
   0x8   :  { %887 = shalt.err (!%p884_p2)
}
   0x9   :  { %s888_s27 = scalar_lea.vmem %s29_s19, 10240  ;;  %p893_p4 = scmp.lt.s32.totalorder %s29_s19, %s29_s19 }
   0xa   :  { %p889_p3 = scmp.ne.s32.totalorder %s29_s19, %s888_s27  ;;  %p894_p5 = scmp.lt.s32.totalorder %s888_s27, %s888_s27 }
   0xc   :  { %p895_p6 = por %p894_p5, %p893_p4 }
   0xe   :  { %p896_p7 = pnand %p895_p6, %p889_p3 }
  0x10   :  { %899 = shalt.err (!%p896_p7)
}
  0x11   :  { %s973_s28 = smov 128   ;;  %s974_s29 = smov 8  }
  0x12   :  { %34 = dma.hbm_to_vmem [thread:$0]  %s1149_s1, 10240, %s29_s19, [#allocation6], %s973_s28, %s973_s28, %s974_s29  }
  0x13   :  { %s975_s7 = smov [#allocation2]   ;;  %s976_s9 = smov [#allocation7]  }
  0x14   :  { %s19_s8 = sshll.u32 %s975_s7, 4  ;;  %s42_s10 = sshll.u32 %s976_s9, 4  ;;  %s20_s8 = int_to_ptr.vmem [resolvable:$true] %s19_s8  ;;  %s43_s10 = int_to_ptr.vmem [resolvable:$true] %s42_s10 }
  0x15   :  { %s900_s13 = scalar_lea.hbm %s1148_s0, 128 }
  0x16   :  { %p901_p8 = scmp.ne.s32.totalorder %s1148_s0, %s900_s13  ;;  %p904_p9 = scmp.lt.u32.totalorder %s900_s13, %s1148_s0 }
  0x18   :  { %p906_p10 = pnand %p904_p9, %p901_p8 }
  0x1a   :  { %909 = shalt.err (!%p906_p10)
}
  0x1b   :  { %s910_s1 = scalar_lea.vmem %s20_s8, 128  ;;  %p915_p12 = scmp.lt.s32.totalorder %s20_s8, %s20_s8 }
  0x1c   :  { %p911_p11 = scmp.ne.s32.totalorder %s20_s8, %s910_s1  ;;  %p916_p13 = scmp.lt.s32.totalorder %s910_s1, %s910_s1 }
  0x1e   :  { %p917_p0 = por %p916_p13, %p915_p12 }
  0x20   :  { %p918_p1 = pnand %p917_p0, %p911_p11 }
  0x22   :  { %921 = shalt.err (!%p918_p1)
}
  0x23   :  { %22 = dma.hbm_to_vmem [thread:$0]  %s1148_s0, 128, %s20_s8, [#allocation3]  }
  0x24   :  { %s922_s22 = scalar_lea.hbm %s1151_s3, 2048 }
  0x25   :  { %p923_p2 = scmp.ne.s32.totalorder %s1151_s3, %s922_s22  ;;  %p926_p3 = scmp.lt.u32.totalorder %s922_s22, %s1151_s3 }
  0x27   :  { %p928_p4 = pnand %p926_p3, %p923_p2 }
  0x29   :  { %931 = shalt.err (!%p928_p4)
}
  0x2a   :  { %s932_s27 = scalar_lea.vmem %s43_s10, 2048  ;;  %p937_p6 = scmp.lt.s32.totalorder %s43_s10, %s43_s10 }
  0x2b   :  { %p933_p5 = scmp.ne.s32.totalorder %s43_s10, %s932_s27  ;;  %p938_p7 = scmp.lt.s32.totalorder %s932_s27, %s932_s27 }
  0x2d   :  { %p939_p8 = por %p938_p7, %p937_p6 }
  0x2f   :  { %p940_p9 = pnand %p939_p8, %p933_p5 }
  0x31   :  { %943 = shalt.err (!%p940_p9)
}
  0x32   :  { %48 = dma.hbm_to_vmem [thread:$0]  %s1151_s3, 2048, %s43_s10, [#allocation6], %s973_s28, %s973_s28, %s974_s29  }
  0x33   :  { %966 = dma.done.wait [#allocation3], 128  }
  0x34   :  { %967 = vsyncadd [#allocation3], 4294967168 }
  0x35   :  { %968 = dma.done.wait [#allocation6], 12288  }
  0x36   :  { %969 = vsyncadd [#allocation6], 4294955008  ;;  %v977_v0 = vmov 0   ;;  %v978_v1 = vmov 2   ;;  %v60_v2 = vld [vmem:[#allocation2] sm:$0xff]  ;;  %v157_v3 = vld [vmem:[#allocation5 + $0x80] sm:$0xff] }
  0x37   :  { %866 = vset.pattern.permute.xlu0 %v977_v0  ;;  %868 = vset.pattern.permute.xlu1 %v978_v1  ;;  %v158_v4 = vld [vmem:[#allocation5 + $0x88] sm:$0xff]  ;;  %v89_v5 = vadd.s32 256, %v60_v2  ;;  %v141_v6 = vld [vmem:[#allocation5] sm:$0xff]  ;;  %v75_v8 = vadd.s32 128, %v60_v2  ;;  %v159_v16 = vld [vmem:[#allocation5 + $0x90] sm:$0xff]  ;;  %v103_v18 = vadd.s32 384, %v60_v2 }
  0x38   :  { %68 = vperm.xlu0 %866, %v60_v2   ;;  %v142_v7 = vld [vmem:[#allocation5 + $0x8] sm:$0xff]  ;;  %v740_v9 = vpack.c.bf16 %v158_v4, %v157_v3  ;;  %v189_v11 = vld [vmem:[#allocation5 + $0x180] sm:$0xff]  ;;  %v160_v17 = vld [vmem:[#allocation5 + $0x98] sm:$0xff]  ;;  %v979_v24 = vmov 1   ;;  %v980_v33 = vmov 3   ;;  %v117_v43 = vadd.s32 512, %v60_v2 }
  0x39   :  { %v742_v10 = vpack.c.bf16 %v142_v7, %v141_v6  ;;  %v190_v12 = vld [vmem:[#allocation5 + $0x188] sm:$0xff]  ;;  %v173_v13 = vld [vmem:[#allocation5 + $0x100] sm:$0xff]  ;;  %91 = vperm.xlu1 %868, %v89_v5   ;;  %v744_v20 = vpack.c.bf16 %v160_v17, %v159_v16  ;;  %v143_v21 = vld [vmem:[#allocation5 + $0x10] sm:$0xff]  ;;  %v981_v51 = vmov 4  }
  0x3a   :  { %v772_v14 = vpack.c.bf16 %v190_v12, %v189_v11  ;;  %v174_v15 = vld [vmem:[#allocation5 + $0x108] sm:$0xff]  ;;  %741 = vmatprep.subr.bf16.mxu0 %v740_v9  ;;  %v144_v22 = vld [vmem:[#allocation5 + $0x18] sm:$0xff]  ;;  %v191_v23 = vld [vmem:[#allocation5 + $0x190] sm:$0xff] }
  0x3b   :  { %v774_v19 = vpack.c.bf16 %v174_v15, %v173_v13  ;;  %743 = vmatpush3.bf16.msra.mxu0 %v742_v10  ;;  %v746_v25 = vpack.c.bf16 %v144_v22, %v143_v21  ;;  %v192_v26 = vld [vmem:[#allocation5 + $0x198] sm:$0xff]  ;;  %v175_v27 = vld [vmem:[#allocation5 + $0x110] sm:$0xff]  ;;  %v161_v30 = vld [vmem:[#allocation5 + $0xa0] sm:$0xff] }
  0x3c   :  { %867 = vset.pattern.permute.xlu0 %v979_v24  ;;  %v176_v28 = vld [vmem:[#allocation5 + $0x118] sm:$0xff]  ;;  %773 = vmatprep.subr.bf16.mxu1 %v772_v14  ;;  %v776_v29 = vpack.c.bf16 %v192_v26, %v191_v23  ;;  %v162_v31 = vld [vmem:[#allocation5 + $0xa8] sm:$0xff]  ;;  %v145_v32 = vld [vmem:[#allocation5 + $0x20] sm:$0xff] }
  0x3d   :  { %77 = vperm.xlu0 %867, %v75_v8   ;;  %869 = vset.pattern.permute.xlu1 %v980_v33  ;;  %v778_v34 = vpack.c.bf16 %v176_v28, %v175_v27  ;;  %v748_v35 = vpack.c.bf16 %v162_v31, %v161_v30  ;;  %v146_v36 = vld [vmem:[#allocation5 + $0x28] sm:$0xff]  ;;  %v193_v37 = vld [vmem:[#allocation5 + $0x1a0] sm:$0xff]  ;;  %v163_v42 = vld [vmem:[#allocation5 + $0xb0] sm:$0xff] }
  0x3e   :  { %775 = vmatpush3.bf16.msra.mxu1 %v774_v19  ;;  %v194_v38 = vld [vmem:[#allocation5 + $0x1a8] sm:$0xff]  ;;  %105 = vperm.xlu1 %869, %v103_v18   ;;  %v177_v40 = vld [vmem:[#allocation5 + $0x120] sm:$0xff]  ;;  %v750_v44 = vpack.c.bf16 %v146_v36, %v145_v32  ;;  %v164_v45 = vld [vmem:[#allocation5 + $0xb8] sm:$0xff] }
  0x3f   :  { %745 = vmatprep.subr.bf16.mxu0 %v744_v20  ;;  %v780_v39 = vpack.c.bf16 %v194_v38, %v193_v37  ;;  %v178_v41 = vld [vmem:[#allocation5 + $0x128] sm:$0xff]  ;;  %777 = vmatprep.subr.bf16.mxu1 %v776_v29  ;;  %v147_v46 = vld [vmem:[#allocation5 + $0x30] sm:$0xff]  ;;  %v752_v47 = vpack.c.bf16 %v164_v45, %v163_v42  ;;  %v148_v48 = vld [vmem:[#allocation5 + $0x38] sm:$0xff]  ;;  %v982_v42 = vmov 0.0|0.0  }
  0x40   :  { %747 = vmatpush3.bf16.msra.mxu0 %v746_v25  ;;  %v195_v49 = vld [vmem:[#allocation5 + $0x1b0] sm:$0xff]  ;;  %v196_v50 = vld [vmem:[#allocation5 + $0x1b8] sm:$0xff]  ;;  %v782_v52 = vpack.c.bf16 %v178_v41, %v177_v40  ;;  %v165_v53 = vld [vmem:[#allocation5 + $0xc0] sm:$0xff]  ;;  %v754_v58 = vpack.c.bf16 %v148_v48, %v147_v46 }
  0x41   :  { %749 = vmatprep.subr.bf16.mxu0 %v748_v35  ;;  %871 = vset.pattern.permute.xlu0 %v981_v51  ;;  %v166_v54 = vld [vmem:[#allocation5 + $0xc8] sm:$0xff]  ;;  %v784_v55 = vpack.c.bf16 %v196_v50, %v195_v49  ;;  %v179_v56 = vld [vmem:[#allocation5 + $0x130] sm:$0xff]  ;;  %v180_v57 = vld [vmem:[#allocation5 + $0x138] sm:$0xff] }
  0x42   :  { %779 = vmatpush3.bf16.msra.mxu1 %v778_v34  ;;  %870 = vset.pattern.permute.xlu1 %v981_v51  ;;  %v197_v59 = vld [vmem:[#allocation5 + $0x1c0] sm:$0xff]  ;;  %v198_v60 = vld [vmem:[#allocation5 + $0x1c8] sm:$0xff]  ;;  %v756_v61 = vpack.c.bf16 %v166_v54, %v165_v53  ;;  %v786_v0 = vpack.c.bf16 %v180_v57, %v179_v56  ;;  %v167_v1 = vld [vmem:[#allocation5 + $0xd0] sm:$0xff] }
  0x43   :  { %781 = vmatprep.subr.bf16.mxu1 %v780_v39  ;;  %119 = vperm.xlu1 %870, %v117_v43   ;;  %v149_v62 = vld [vmem:[#allocation5 + $0x40] sm:$0xff]  ;;  %v150_v63 = vld [vmem:[#allocation5 + $0x48] sm:$0xff]  ;;  %v168_v2 = vld [vmem:[#allocation5 + $0xd8] sm:$0xff]  ;;  %v788_v3 = vpack.c.bf16 %v198_v60, %v197_v59  ;;  %v61_v43 = vlaneseq }
  0x44   :  { %751 = vmatpush3.bf16.msra.mxu0 %v750_v44  ;;  %v181_v4 = vld [vmem:[#allocation5 + $0x140] sm:$0xff]  ;;  %v182_v5 = vld [vmem:[#allocation5 + $0x148] sm:$0xff]  ;;  %v758_v6 = vpack.c.bf16 %v150_v63, %v149_v62  ;;  %v199_v7 = vld [vmem:[#allocation5 + $0x1d0] sm:$0xff]  ;;  %v760_v9 = vpack.c.bf16 %v168_v2, %v167_v1 }
  0x45   :  { %753 = vmatprep.subr.bf16.mxu0 %v752_v47  ;;  %v200_v8 = vld [vmem:[#allocation5 + $0x1d8] sm:$0xff]  ;;  %v151_v10 = vld [vmem:[#allocation5 + $0x50] sm:$0xff]  ;;  %v790_v12 = vpack.c.bf16 %v182_v5, %v181_v4  ;;  %v169_v13 = vld [vmem:[#allocation5 + $0xe0] sm:$0xff]  ;;  %v1060_v44 = vand.u32 127, %v61_v43 }
  0x46   :  { %783 = vmatpush3.bf16.msra.mxu1 %v782_v52  ;;  %v152_v11 = vld [vmem:[#allocation5 + $0x58] sm:$0xff]  ;;  %v170_v14 = vld [vmem:[#allocation5 + $0xe8] sm:$0xff]  ;;  %v792_v15 = vpack.c.bf16 %v200_v8, %v199_v7  ;;  %v183_v16 = vld [vmem:[#allocation5 + $0x150] sm:$0xff] }
  0x47   :  { %785 = vmatprep.subr.bf16.mxu1 %v784_v55  ;;  %v184_v17 = vld [vmem:[#allocation5 + $0x158] sm:$0xff]  ;;  %v762_v18 = vpack.c.bf16 %v152_v11, %v151_v10  ;;  %v201_v19 = vld [vmem:[#allocation5 + $0x1e0] sm:$0xff]  ;;  %v202_v20 = vld [vmem:[#allocation5 + $0x1e8] sm:$0xff]  ;;  %v764_v21 = vpack.c.bf16 %v170_v14, %v169_v13  ;;  %v63_v47 = vadd.s32 128, %v1060_v44  ;;  %v65_v49 = vadd.s32 384, %v1060_v44 }
  0x48   :  { %755 = vmatpush3.bf16.msra.mxu0 %v754_v58  ;;  %v153_v22 = vld [vmem:[#allocation5 + $0x60] sm:$0xff]  ;;  %v154_v23 = vld [vmem:[#allocation5 + $0x68] sm:$0xff]  ;;  %v794_v24 = vpack.c.bf16 %v184_v17, %v183_v16  ;;  %v171_v25 = vld [vmem:[#allocation5 + $0xf0] sm:$0xff]  ;;  %v796_v27 = vpack.c.bf16 %v202_v20, %v201_v19  ;;  %v64_v52 = vadd.s32 256, %v1060_v44  ;;  %v983_v55 = vmov 0.0  }
  0x49   :  { %757 = vmatprep.subr.bf16.mxu0 %v756_v61  ;;  %v172_v26 = vld [vmem:[#allocation5 + $0xf8] sm:$0xff]  ;;  %v185_v28 = vld [vmem:[#allocation5 + $0x160] sm:$0xff]  ;;  %v186_v29 = vld [vmem:[#allocation5 + $0x168] sm:$0xff]  ;;  %v766_v30 = vpack.c.bf16 %v154_v23, %v153_v22  ;;  %v66_v11 = vadd.s32 512, %v1060_v44 }
  0x4a   :  { %787 = vmatpush3.bf16.msra.mxu1 %v786_v0  ;;  %v203_v31 = vld [vmem:[#allocation5 + $0x1f0] sm:$0xff]  ;;  %v204_v32 = vld [vmem:[#allocation5 + $0x1f8] sm:$0xff]  ;;  %v768_v33 = vpack.c.bf16 %v172_v26, %v171_v25  ;;  %v798_v36 = vpack.c.bf16 %v186_v29, %v185_v28  ;;  %v205_v53 = vld [vmem:[#allocation5 + $0x200] sm:$0xff] }
  0x4b   :  { %789 = vmatprep.subr.bf16.mxu1 %v788_v3  ;;  %v155_v34 = vld [vmem:[#allocation5 + $0x70] sm:$0xff]  ;;  %v156_v35 = vld [vmem:[#allocation5 + $0x78] sm:$0xff]  ;;  %v800_v37 = vpack.c.bf16 %v204_v32, %v203_v31  ;;  %v206_v54 = vld [vmem:[#allocation5 + $0x208] sm:$0xff] }
  0x4c   :  { %759 = vmatpush3.bf16.msra.mxu0 %v758_v6  ;;  %v187_v38 = vld [vmem:[#allocation5 + $0x170] sm:$0xff]  ;;  %v188_v39 = vld [vmem:[#allocation5 + $0x178] sm:$0xff]  ;;  %v770_v40 = vpack.c.bf16 %v156_v35, %v155_v34  ;;  %v805_v58 = vpack.c.bf16 %v206_v54, %v205_v53  ;;  %v209_v63 = vld [vmem:[#allocation5 + $0x220] sm:$0xff] }
  0x4d   :  { %761 = vmatprep.subr.bf16.mxu0 %v760_v9  ;;  %v802_v41 = vpack.c.bf16 %v188_v39, %v187_v38  ;;  %v207_v59 = vld [vmem:[#allocation5 + $0x210] sm:$0xff]  ;;  %v208_v60 = vld [vmem:[#allocation5 + $0x218] sm:$0xff]  ;;  %v210_v0 = vld [vmem:[#allocation5 + $0x228] sm:$0xff] }
  0x4e   :  { %791 = vmatpush3.bf16.msra.mxu1 %v790_v12  ;;  %v808_v62 = vpack.c.bf16 %v208_v60, %v207_v59  ;;  %v811_v2 = vpack.c.bf16 %v210_v0, %v209_v63  ;;  %v211_v3 = vld [vmem:[#allocation5 + $0x230] sm:$0xff]  ;;  %v212_v4 = vld [vmem:[#allocation5 + $0x238] sm:$0xff]  ;;  %v213_v6 = vld [vmem:[#allocation5 + $0x240] sm:$0xff] }
  0x4f   :  { %793 = vmatprep.subr.bf16.mxu1 %v792_v15  ;;  %v814_v5 = vpack.c.bf16 %v212_v4, %v211_v3  ;;  %v214_v7 = vld [vmem:[#allocation5 + $0x248] sm:$0xff]  ;;  %v215_v9 = vld [vmem:[#allocation5 + $0x250] sm:$0xff]  ;;  %v216_v10 = vld [vmem:[#allocation5 + $0x258] sm:$0xff] }
  0x50   :  { %763 = vmatpush3.bf16.msra.mxu0 %v762_v18  ;;  %v817_v8 = vpack.c.bf16 %v214_v7, %v213_v6  ;;  %v820_v12 = vpack.c.bf16 %v216_v10, %v215_v9  ;;  %v217_v13 = vld [vmem:[#allocation5 + $0x260] sm:$0xff]  ;;  %v218_v14 = vld [vmem:[#allocation5 + $0x268] sm:$0xff]  ;;  %v219_v16 = vld [vmem:[#allocation5 + $0x270] sm:$0xff] }
  0x51   :  { %765 = vmatprep.subr.bf16.mxu0 %v764_v21  ;;  %v823_v15 = vpack.c.bf16 %v218_v14, %v217_v13  ;;  %v220_v17 = vld [vmem:[#allocation5 + $0x278] sm:$0xff]  ;;  %v439_v20 = vld [vmem:[#allocation7] sm:$0xff]  ;;  %v440_v21 = vld [vmem:[#allocation7 + $0x8] sm:$0xff] }
  0x52   :  { %795 = vmatpush3.bf16.msra.mxu1 %v794_v24  ;;  %v826_v18 = vpack.c.bf16 %v220_v17, %v219_v16  ;;  %v441_v22 = vld [vmem:[#allocation7 + $0x10] sm:$0xff]  ;;  %v829_v23 = vpack.c.bf16 %v440_v21, %v439_v20  ;;  %v442_v24 = vld [vmem:[#allocation7 + $0x18] sm:$0xff]  ;;  %v443_v26 = vld [vmem:[#allocation7 + $0x20] sm:$0xff] }
  0x53   :  { %797 = vmatprep.subr.bf16.mxu1 %v796_v27  ;;  %v832_v25 = vpack.c.bf16 %v442_v24, %v441_v22  ;;  %v444_v27 = vld [vmem:[#allocation7 + $0x28] sm:$0xff]  ;;  %v445_v29 = vld [vmem:[#allocation7 + $0x30] sm:$0xff]  ;;  %v447_v32 = vld [vmem:[#allocation7 + $0x40] sm:$0xff] }
  0x54   :  { %767 = vmatpush3.bf16.msra.mxu0 %v766_v30  ;;  %v835_v28 = vpack.c.bf16 %v444_v27, %v443_v26  ;;  %v446_v30 = vld [vmem:[#allocation7 + $0x38] sm:$0xff]  ;;  %v449_v35 = vld [vmem:[#allocation7 + $0x50] sm:$0xff]  ;;  %v452_v39 = vld [vmem:[#allocation7 + $0x68] sm:$0xff] }
  0x55   :  { %769 = vmatprep.subr.bf16.mxu0 %v768_v33  ;;  %v838_v31 = vpack.c.bf16 %v446_v30, %v445_v29  ;;  %v448_v33 = vld [vmem:[#allocation7 + $0x48] sm:$0xff]  ;;  %v454_v43 = vld [vmem:[#allocation7 + $0x78] sm:$0xff] }
  0x56   :  { %799 = vmatpush3.bf16.msra.mxu1 %v798_v36  ;;  %v841_v34 = vpack.c.bf16 %v448_v33, %v447_v32  ;;  %v450_v36 = vld [vmem:[#allocation7 + $0x58] sm:$0xff] }
  0x57   :  { %801 = vmatprep.subr.bf16.mxu1 %v800_v37  ;;  %v451_v37 = vld [vmem:[#allocation7 + $0x60] sm:$0xff]  ;;  %v844_v38 = vpack.c.bf16 %v450_v36, %v449_v35 }
  0x58   :  { %771 = vmatpush3.bf16.msra.mxu0 %v770_v40  ;;  %v847_v40 = vpack.c.bf16 %v452_v39, %v451_v37 }
  0x59   :  { %804 = vmatprep.subr.bf16.mxu0 %v982_v42 }
  0x5a   :  { %803 = vmatpush3.bf16.msra.mxu1 %v802_v41  ;;  %v453_v41 = vld [vmem:[#allocation7 + $0x70] sm:$0xff] }
  0x5b   :  { %828 = vmatprep.subr.bf16.mxu1 %v982_v42 }
  0xb7   :  { %v1062_v45 = vpop.permute.xlu0 %68 }
  0xb8   :  { %v1064_v46 = vpop.permute.xlu1 %91  ;;  %vm71_vm0 = vcmp.eq.s32.totalorder %v63_v47, %v1062_v45  ;;  %vm73_vm4 = vcmp.eq.s32.totalorder %v65_v49, %v1062_v45  ;;  %vm70_vm12 = vcmp.eq.s32.totalorder %v1060_v44, %v1062_v45 }
  0xb9   :  { %vm94_vm3 = vcmp.eq.s32.totalorder %v63_v47, %v1064_v46  ;;  %vm96_vm11 = vcmp.eq.s32.totalorder %v65_v49, %v1064_v46 }
  0xbc   :  { %v1068_v48 = vpop.permute.xlu0 %77 }
  0xbd   :  { %vm80_vm1 = vcmp.eq.s32.totalorder %v63_v47, %v1068_v48  ;;  %v1072_v50 = vpop.permute.xlu1 %105  ;;  %vm82_vm5 = vcmp.eq.s32.totalorder %v65_v49, %v1068_v48  ;;  %vm79_vm13 = vcmp.eq.s32.totalorder %v1060_v44, %v1068_v48 }
  0xbe   :  { %vm85_vm2 = vmor %vm71_vm0, %vm80_vm1  ;;  %vm108_vm7 = vcmp.eq.s32.totalorder %v63_v47, %v1072_v50  ;;  %vm110_vm9 = vcmp.eq.s32.totalorder %v65_v49, %v1072_v50 }
  0xbf   :  { %vm99_vm6 = vmor %vm85_vm2, %vm94_vm3 }
  0xc0   :  { %vm113_vm8 = vmor %vm99_vm6, %vm108_vm7  ;;  %vm93_vm6 = vcmp.eq.s32.totalorder %v1060_v44, %v1064_v46 }
  0xc1   :  { %vm87_vm10 = vmor %vm73_vm4, %vm82_vm5  ;;  %vm107_vm4 = vcmp.eq.s32.totalorder %v1060_v44, %v1072_v50 }
  0xc2   :  { %vm101_vm14 = vmor %vm87_vm10, %vm96_vm11  ;;  %v1084_v51 = vpop.permute.xlu1 %119  ;;  %vm81_vm10 = vcmp.eq.s32.totalorder %v64_v52, %v1068_v48 }
  0xc3   :  { %vm115_vm15 = vmor %vm101_vm14, %vm110_vm9  ;;  %vm122_vm0 = vcmp.eq.s32.totalorder %v63_v47, %v1084_v51  ;;  %vm124_vm1 = vcmp.eq.s32.totalorder %v65_v49, %v1084_v51  ;;  %vm121_vm7 = vcmp.eq.s32.totalorder %v1060_v44, %v1084_v51  ;;  %vm72_vm9 = vcmp.eq.s32.totalorder %v64_v52, %v1062_v45 }
  0xc4   :  { %vm84_vm2 = vmor %vm70_vm12, %vm79_vm13  ;;  %vm109_vm13 = vcmp.eq.s32.totalorder %v64_v52, %v1072_v50  ;;  %v850_v44 = vpack.c.bf16 %v454_v43, %v453_v41 }
  0xc5   :  { %vm127_vm3 = vmor %vm113_vm8, %vm122_vm0  ;;  %vm123_vm0 = vcmp.eq.s32.totalorder %v64_v52, %v1084_v51 }
  0xc6   :  { %v560_v56 = vsel %vm127_vm3, 1.0, %v983_v55  ;;  %vm129_vm5 = vmor %vm115_vm15, %vm124_vm1  ;;  %vm95_vm15 = vcmp.eq.s32.totalorder %v64_v52, %v1064_v46  ;;  %vm984_vm3 = vmmov 0  }
  0xc7   :  { %292 = vmatprep.mubr.f32.mxu0 %v560_v56  ;;  %v562_v57 = vsel %vm129_vm5, 1.0, %v983_v55  ;;  %vm98_vm8 = vmor %vm84_vm2, %vm93_vm6  ;;  %vm74_vm5 = vcmp.eq.s32.totalorder %v66_v11, %v1062_v45  ;;  %vm83_vm6 = vcmp.eq.s32.totalorder %v66_v11, %v1068_v48 }
  0xc8   :  { %362 = vmatprep.mubr.f32.mxu1 %v562_v57  ;;  %vm112_vm11 = vmor %vm98_vm8, %vm107_vm4  ;;  %vm97_vm8 = vcmp.eq.s32.totalorder %v66_v11, %v1064_v46  ;;  %v564_v46 = vld [vmem:[%s1150_s2] ss:$0 sm:$0xff]  ;;  %s985_s2 = smov [#allocation8]  }
  0xc9   :  { %vm126_vm12 = vmor %vm112_vm11, %vm121_vm7  ;;  %vm125_vm11 = vcmp.eq.s32.totalorder %v66_v11, %v1084_v51  ;;  %s549_s7 = sshll.u32 %s985_s2, 4  ;;  %s550_s7 = int_to_ptr.vmem [resolvable:$true] %s549_s7 }
  0xca   :  { %v559_v61 = vsel %vm126_vm12, 1.0, %v983_v55  ;;  %vm86_vm14 = vmor %vm72_vm9, %vm81_vm10  ;;  %vm111_vm10 = vcmp.eq.s32.totalorder %v66_v11, %v1072_v50  ;;  %p949_p11 = scmp.lt.s32.totalorder %s550_s7, %s550_s7 }
  0xcb   :  { %293 = vmatmul.mubr.f32.vlgmr.msra.gmra.mrb[0].mxu0 %v559_v61  ;;  %vm100_vm1 = vmor %vm86_vm14, %vm95_vm15 }
  0xcc   :  { %vm114_vm2 = vmor %vm100_vm1, %vm109_vm13  ;;  %806 = vmatpush3.bf16.msra.mxu0 %v805_v58  ;;  %702 = vmatprep.mubr.msk.f32.mxu0 %vm984_vm3, %v983_v55 }
  0xcd   :  { %vm128_vm4 = vmor %vm114_vm2, %vm123_vm0  ;;  %807 = vmatprep.subr.bf16.mxu0 %v982_v42 }
  0xce   :  { %v561_v1 = vsel %vm128_vm4, 1.0, %v983_v55  ;;  %vm88_vm7 = vmor %vm74_vm5, %vm83_vm6 }
  0xcf   :  { %363 = vmatmul.mubr.f32.vlgmr.msra.gmra.mrb[0].mxu1 %v561_v1  ;;  %vm102_vm9 = vmor %vm88_vm7, %vm97_vm8 }
  0xd0   :  { %809 = vmatpush3.bf16.msra.mxu0 %v808_v62  ;;  %737 = vmatprep.mubr.msk.f32.mxu1 %vm984_vm3, %v983_v55  ;;  %vm116_vm12 = vmor %vm102_vm9, %vm111_vm10 }
  0xd1   :  { %810 = vmatprep.subr.bf16.mxu0 %v982_v42  ;;  %vm130_vm13 = vmor %vm116_vm12, %vm125_vm11  ;;  %830 = vmatpush3.bf16.msra.mxu1 %v829_v23 }
  0xd2   :  { %v563_v19 = vsel %vm130_vm13, 1.0, %v983_v55  ;;  %831 = vmatprep.subr.bf16.mxu1 %v982_v42 }
  0xd4   :  { %812 = vmatpush3.bf16.msra.mxu0 %v811_v2 }
  0xd5   :  { %813 = vmatprep.subr.bf16.mxu0 %v982_v42  ;;  %833 = vmatpush3.bf16.msra.mxu1 %v832_v25 }
  0xd6   :  { %834 = vmatprep.subr.bf16.mxu1 %v982_v42 }
  0xd8   :  { %815 = vmatpush3.bf16.msra.mxu0 %v814_v5 }
  0xd9   :  { %816 = vmatprep.subr.bf16.mxu0 %v982_v42  ;;  %836 = vmatpush3.bf16.msra.mxu1 %v835_v28 }
  0xda   :  { %837 = vmatprep.subr.bf16.mxu1 %v982_v42 }
  0xdc   :  { %818 = vmatpush3.bf16.msra.mxu0 %v817_v8 }
  0xdd   :  { %819 = vmatprep.subr.bf16.mxu0 %v982_v42  ;;  %839 = vmatpush3.bf16.msra.mxu1 %v838_v31 }
  0xde   :  { %840 = vmatprep.subr.bf16.mxu1 %v982_v42 }
  0xe0   :  { %821 = vmatpush3.bf16.msra.mxu0 %v820_v12 }
  0xe1   :  { %822 = vmatprep.subr.bf16.mxu0 %v982_v42  ;;  %842 = vmatpush3.bf16.msra.mxu1 %v841_v34 }
  0xe2   :  { %843 = vmatprep.subr.bf16.mxu1 %v982_v42 }
  0xe4   :  { %824 = vmatpush3.bf16.msra.mxu0 %v823_v15 }
  0xe5   :  { %825 = vmatprep.subr.bf16.mxu0 %v982_v42  ;;  %845 = vmatpush3.bf16.msra.mxu1 %v844_v38 }
  0xe6   :  { %846 = vmatprep.subr.bf16.mxu1 %v982_v42 }
  0xe8   :  { %827 = vmatpush3.bf16.msra.mxu0 %v826_v18 }
  0xe9   :  { %848 = vmatpush3.bf16.msra.mxu1 %v847_v40 }
  0xea   :  { %849 = vmatprep.subr.bf16.mxu1 %v982_v42  ;;  %v565_v42 = vld [vmem:[%s1152_s4] ss:$0 sm:$0xff]  ;;  %s944_s4 = scalar_lea.vmem %s550_s7, 128 }
  0xeb   :  { %703 = vmatmul.mubr.f32.vlgmr.msra.gmra.mrb[2].mxu0 %v563_v19  ;;  %p945_p10 = scmp.ne.s32.totalorder %s550_s7, %s944_s4  ;;  %p950_p12 = scmp.lt.s32.totalorder %s944_s4, %s944_s4 }
  0xed   :  { %851 = vmatpush3.bf16.msra.mxu1 %v850_v44  ;;  %p951_p13 = por %p950_p12, %p949_p11 }
  0xef   :  { %p952_p0 = pnand %p951_p13, %p945_p10 }
 0x19e   :  { %v598_v45 = vpop.f32.mrb[0].mxu0 }
 0x19f   :  { %v599_v47 = vpop.f32.mrb[1].mxu0 }
 0x1a0   :  { %v600_v48 = vadd.f32 %v599_v47, %v598_v45 }
 0x1a2   :  { %v633_v49 = vpop.f32.mrb[0].mxu1  ;;  %v295_v50 = vadd.f32 %v600_v48, %v564_v46 }
 0x1a3   :  { %v634_v51 = vpop.f32.mrb[1].mxu1 }
 0x1a4   :  { %v635_v52 = vadd.f32 %v634_v51, %v633_v49 }
 0x1a6   :  { %v365_v53 = vadd.f32 %v635_v52, %v295_v50 }
 0x1be   :  { %v434_v54 = vpop.f32.mrb[2].mxu0 }
 0x1bf   :  { %v435_v55 = vadd.f32 %v434_v54, %v365_v53  ;;  %v704_v56 = vpop.f32.mrb[3].mxu0 }
 0x1c1   :  { %872 = vtanh.f32 %v435_v55 }
 0x1cb   :  { %v873_v57 = vpop.eup %872 }
 0x1cc   :  { %738 = vmatmul.mubr.f32.vlgmr.msra.gmra.mrb[2].mxu1 %v873_v57 }
 0x29f   :  { %v528_v58 = vpop.f32.mrb[2].mxu1 }
 0x2a0   :  { %v529_v59 = vadd.f32 %v565_v42, %v528_v58  ;;  %v739_v60 = vpop.f32.mrb[3].mxu1 }
 0x2a2   :  { %532 = vmax.xlane.f32.xlu0 %v529_v59 }
 0x32f   :  { %v533_v61 = vpop.xlane.xlu0 %532 }
 0x330   :  { %v534_v62 = vsub.f32 %v529_v59, %v533_v61 }
 0x332   :  { %v535_v63 = vmul.f32 1.442695, %v534_v62 }
 0x334   :  { %874 = vpow2.f32 %v535_v63 }
 0x33e   :  { %v875_v0 = vpop.eup %874 }
 0x33f   :  { %537 = vadd.xlane.f32.xlu1 %v875_v0 }
 0x3cc   :  { %v538_v1 = vpop.xlane.xlu1 %537 }
 0x3cd   :  { %876 = vlog2.f32 %v538_v1 }
 0x3d7   :  { %v877_v2 = vpop.eup %876 }
 0x3d8   :  { %v540_v3 = vmul.f32 0.6931472, %v877_v2 }
 0x3da   :  { %v541_v4 = vsub.f32 %v534_v62, %v540_v3 }
 0x3dc   :  { %542 = vst [vmem:[#allocation8] sm:$0xff] %v541_v4 }
 0x3dd   :  { %955 = shalt.err (!%p952_p0)
}
 0x3de   :  { %s956_s10 = scalar_lea.hbm %s1153_s5, 128 }
 0x3df   :  { %p957_p1 = scmp.ne.s32.totalorder %s1153_s5, %s956_s10  ;;  %p960_p2 = scmp.lt.u32.totalorder %s956_s10, %s1153_s5 }
 0x3e1   :  { %p962_p3 = pnand %p960_p2, %p957_p1 }
 0x3e3   :  { %965 = shalt.err (!%p962_p3)
}
 0x3e4   :  { %552 = dma.vmem_to_hbm [thread:$0]  %s550_s7, 128, %s1153_s5, [#allocation4]  }
 0x3e5   :  { %970 = dma.done.wait [#allocation4], 128  }
 0x3e6   :  { %971 = vsyncadd [#allocation4], 4294967168 }
 0x3e7   :  { %556 = vsyncpa [#allocation3], 1 }
 0x3e8   :  { %557 = vsyncpa [#allocation6], 1 }
 0x3e9   :  { %558 = vsyncpa [#allocation4], 1 }

</bundles_post_ra>
